<compile_context>
chip_gen: v5e
topology: v5e:2x2
jax: 0.10.0
libtpu: 0.0.40
codegen_flags: <defaults>
</compile_context>

<pallas_src>
import jax
import jax.numpy as jnp
from jax.experimental import pallas as pl
from jax.experimental.pallas import tpu as pltpu

LANES = 128


def _round_up(x, m):
    return ((x + m - 1) // m) * m


def _swish_kernel(x_ref, o_ref):
    # swish / SiLU: x * sigmoid(x).  Upcast to f32 (v5e has no bf16 VPU/EUP);
    # sigmoid lowers to the EUP, leaving VALU slots mostly free.  The kernel
    # is DMA-bound anyway, so compute is comfortably under the HBM roofline.
    xf = x_ref[...].astype(jnp.float32)
    o_ref[...] = (xf * jax.nn.sigmoid(xf)).astype(o_ref.dtype)


def swish(x, *, tile_rows=None, min_pallas_elems=1 << 16):
    """Elementwise swish (x * sigmoid(x)) on an arbitrarily shaped array."""
    orig_shape = x.shape
    orig_dtype = x.dtype
    n = x.size

    if n == 0:
        return x

    # Small-input fast path: fixed launch + per-step overhead dominates tiny
    # inputs; the Pallas path only pays off once HBM traffic is non-trivial.
    if n < min_pallas_elems:
        xf = x.astype(jnp.float32)
        return (xf * jax.nn.sigmoid(xf)).astype(orig_dtype)

    itemsize = jnp.dtype(orig_dtype).itemsize
    # Sublane packing: 8 rows for 32-bit, 16 for 16-bit, 32 for 8-bit dtypes.
    sub = max(8, 32 // max(itemsize, 1))

    # ~2 MiB per block; in + out are each double-buffered => ~8 MiB VMEM,
    # safely under the 16 MiB (v5e) / 32 MiB (v6e, v7x) scoped-VMEM defaults.
    if tile_rows is None:
        block_bytes_target = 2 * 1024 * 1024
        tile_rows = max(sub, (block_bytes_target // (LANES * itemsize)) // sub * sub)

    rows = pl.cdiv(n, LANES)
    # Keep the grid at >= 2 steps when the input allows it (v7x has 2 TCs),
    # and round the row-tile to the sublane multiple so every block satisfies
    # the (8, 128) divisibility rule -- no degenerate / masked tiles.
    tr = min(tile_rows, _round_up(pl.cdiv(rows, 2), sub))
    tr = max(sub, _round_up(tr, sub))
    padded_rows = _round_up(rows, tr)
    grid = (padded_rows // tr,)

    flat = x.reshape(-1)
    pad = padded_rows * LANES - n
    if pad:
        flat = jnp.pad(flat, (0, pad))  # zero pad; swish(0) = 0, sliced off below
    x2d = flat.reshape(padded_rows, LANES)

    out = pl.pallas_call(
        _swish_kernel,
        out_shape=jax.ShapeDtypeStruct((padded_rows, LANES), orig_dtype),
        grid_spec=pltpu.PrefetchScalarGridSpec(
            num_scalar_prefetch=0,
            grid=grid,
            in_specs=[pl.BlockSpec((tr, LANES), lambda i: (i, 0))],
            out_specs=pl.BlockSpec((tr, LANES), lambda i: (i, 0)),
        ),
        compiler_params=pltpu.CompilerParams(
            dimension_semantics=("parallel",),
        ),
    )(x2d)

    out_flat = out.reshape(-1)
    if pad:
        out_flat = out_flat[:n]
    return out_flat.reshape(orig_shape)


def _ref_swish(x):
    xf = x.astype(jnp.float32)
    return (xf * jax.nn.sigmoid(xf)).astype(x.dtype)


if __name__ == "__main__":
    key = jax.random.PRNGKey(0)
    k0, k1, k2 = jax.random.split(key, 3)

    # 1) Small NCHW input (matches the PyTorch module usage); force the Pallas
    #    path so the kernel itself is exercised on this size.
    x = jax.random.normal(k0, (2, 4, 16, 16), dtype=jnp.float32)
    y = jax.block_until_ready(swish(x, min_pallas_elems=0))
    assert y.shape == x.shape and y.dtype == x.dtype
    assert jnp.allclose(y, _ref_swish(x), atol=1e-6, rtol=1e-6)

    # 2) Ragged element count (not a multiple of 128) -> exercises the padding
    #    + multi-step grid path.
    xr = jax.random.normal(k1, (3, 5, 17, 19), dtype=jnp.float32)
    yr = jax.block_until_ready(swish(xr, min_pallas_elems=0))
    assert yr.shape == xr.shape
    assert jnp.allclose(yr, _ref_swish(xr), atol=1e-6, rtol=1e-6)

    # 3) bf16 I/O passthrough (compute still in f32 inside the kernel).
    xb = jax.random.normal(k2, (2, 4, 16, 16), dtype=jnp.bfloat16)
    yb = jax.block_until_ready(swish(xb, min_pallas_elems=0))
    assert yb.shape == xb.shape and yb.dtype == jnp.bfloat16
    assert jnp.allclose(yb.astype(jnp.float32),
                        _ref_swish(xb).astype(jnp.float32),
                        atol=2e-2, rtol=2e-2)

    # 4) Default small-input fast path (plain JAX, no pallas_call).
    yf = jax.block_until_ready(swish(x))
    assert jnp.allclose(yf, _ref_swish(x), atol=1e-6, rtol=1e-6)

    print("KERNEL_OK")
</pallas_src>

<mosaic_0001>
module attributes {stable_mosaic.version = 11 : i64} {
  func.func @_swish_kernel(%arg0: i32, %arg1: memref<8x128xf32, #tpu.memory_space<vmem>>, %arg2: memref<8x128xf32, #tpu.memory_space<vmem>>) attributes {dimension_semantics = [#tpu.dimension_semantics<parallel>], iteration_bounds = array<i64: 2>, scalar_prefetch = 0 : i64, scratch_operands = 0 : i64, tpu.core_type = #tpu.core_type<tc>, window_params = [{transform_indices = @transform_0, window_bounds = array<i64: 8, 128>}, {transform_indices = @transform_1, window_bounds = array<i64: 8, 128>}]} {
    %c0 = arith.constant 0 : index
    %c0_0 = arith.constant 0 : index
    %0 = vector.load %arg1[%c0, %c0_0] : memref<8x128xf32, #tpu.memory_space<vmem>>, vector<8x128xf32>
    %1 = arith.negf %0 : vector<8x128xf32>
    %2 = math.exp %1 : vector<8x128xf32>
    %cst = arith.constant 1.000000e+00 : f32
    %3 = vector.broadcast %cst : f32 to vector<8x128xf32>
    %4 = arith.addf %3, %2 : vector<8x128xf32>
    %5 = arith.divf %3, %4 : vector<8x128xf32>
    %6 = arith.mulf %0, %5 : vector<8x128xf32>
    %c0_1 = arith.constant 0 : index
    %c0_2 = arith.constant 0 : index
    %7 = vector.load %arg2[%c0_1, %c0_2] : memref<8x128xf32, #tpu.memory_space<vmem>>, vector<8x128xf32>
    tpu.vector_store %arg2[%c0_1, %c0_2], %6 {strides = array<i32>} : memref<8x128xf32, #tpu.memory_space<vmem>>, vector<8x128xf32>,
    return
  }
  func.func @transform_0(%arg0: i32) -> (i32, i32) {
    %c0_i32 = arith.constant 0 : i32
    %c0_i32_0 = arith.constant 0 : i32
    return %arg0, %c0_i32 : i32, i32
  }
  func.func @transform_1(%arg0: i32) -> (i32, i32) {
    %c0_i32 = arith.constant 0 : i32
    %c0_i32_0 = arith.constant 0 : i32
    return %arg0, %c0_i32 : i32, i32
  }
}

</mosaic_0001>

<bundles_post_ra>
// kernel: tpu_custom_call.1
= control target key start
LH: loop header
LB: loop body
LE: loop exit
PB: predicated region body
PF: predicated region fallthrough
CT: control target
= control target key end

     0   :  { %6 = vsyncpa [#allocation3], 0  ;;  %s540_s0 = inlined_call_operand.hbm [shape: f32[16,128], index: 0, kind: input, shape index: {}]   ;;  %s541_s1 = inlined_call_operand.hbm [shape: f32[16,128], index: 1, kind: output, shape index: {}]  }
   0x1   :  { %8 = vsyncpa [#allocation3 + $0x1], 0 }
   0x2   :  { %9 = vsyncpa [#allocation4], 0 }
   0x3   :  { %11 = vsyncpa [#allocation4 + $0x1], 0  ;;  %s413_s6 = smov 0   ;;  %s415_s7 = smov 0  }
   0x4   :  { %s417_s8 = smov 0   ;;  %s419_s9 = smov 0  }
   0x5 LB: > { %s434_s10 = sadd.s32 4294967295, %s401_s9   ;;  %s242_s11 = sadd.s32 4294967294, %s401_s9   ;;  %s401_s9 = sphi %s419_s9, %s551_s9   ;;  %s397_s8 = sphi %s417_s8, %s550_s8   ;;  %s393_s7 = sphi %s415_s7, %s549_s7   ;;  %s389_s6 = sphi %s413_s6, %s548_s6  }
   0x6   : > { %s438_s12 = sadd.s32 1, %s401_s9   ;;  %s24_s13 = sadd.s32 1, %s397_s8 }
   0x7   : > { %s21_s14 = ssub.s32 %s401_s9, %s438_s12  ;;  %p31_p0 = scmp.ne.s32.totalorder %s397_s8, %s393_s7 }
   0x8   : > { %p22_p1 = scmp.eq.s32.totalorder %s21_s14, 0  ;;  %p32_p2 = scmp.eq.s32.totalorder %s401_s9, 0 }
   0x9   : > { %p37_p3 = scmp.ne.s32.totalorder %s393_s7, %s389_s6  ;;  %p38_p4 = scmp.eq.s32.totalorder %s434_s10, 0 }
   0xa   : > { %s450_s15 = scalar_select %p22_p1, %s397_s8, %s24_s13  }
   0xb   : > { %p452_p5 = por %p32_p2, %p31_p0  ;;  %p456_p6 = por %p38_p4, %p37_p3 }
   0xc   : > { %p61_p7 = scmp.eq.s32.totalorder %s434_s10, 1  ;;  %p67_p8 = scmp.eq.s32.totalorder %s242_s11, 1 }
   0xd   : > { %p267_p10 = scmp.lt.s32.totalorder %s401_s9, 2  ;;  %s87_s20 = sand.u32 1, %s397_s8  }
   0xe   : > { %p463_p11 = por %p61_p7, %p31_p0  ;;  %p467_p12 = por %p67_p8, %p37_p3 }
   0xf   : > { %s246_s21 = sshll.u32 %s401_s9, 3  ;;  %s245_s22 = sshll.u32 %s87_s20, 3 }
  0x10   : > { %s95_s25 = scalar_lea.hbm %s540_s0, %s246_s21  ;;  %s91_s27 = scalar_lea.vmem [#allocation2], %s245_s22 }
  0x11   : > { %s97_s26 = sshll.u32 %s95_s25, 4  ;;  %s99_s28 = sshll.u32 %s91_s27, 4  ;;  %s98_s26 = int_to_ptr.hbm [resolvable:$true] %s97_s26  ;;  %s100_s28 = int_to_ptr.vmem [resolvable:$true] %s99_s28 }
  0x12   : > { %p478_p13 = pnand %p267_p10, %p452_p5  ;;  %p247_p0 = scmp.ge.s32.totalorder %s401_s9, 1 }
  0x13   : > { %p104_p1 = scmp.lt.s32.totalorder %s401_s9, 3  ;;  %s88_s30 = scalar_lea.sflag [#allocation3], %s87_s20 }
  0x14   : > { %s305_s2 = sshra.s32 %s98_s26, 4  ;;  %p309_p3 = pneg %p478_p13  ;;  %s306_s2 = int_to_ptr.hbm [resolvable:$true] %s305_s2 }
  0x15   : > { %s307_s3 = scalar_lea.hbm %s306_s2, 8  ;;  %s312_s11 = scalar_lea.hbm %s540_s0, 16 }
  0x16   : > { %p308_p2 = scmp.ne.s32.totalorder %s306_s2, %s307_s3  ;;  %p313_p5 = scmp.lt.s32.totalorder %s306_s2, %s540_s0 }
  0x17   : > { %p314_p8 = scmp.lt.s32.totalorder %s312_s11, %s307_s3 }
  0x18   : > { %p310_p4 = pnand %p309_p3, %p308_p2 }
  0x19   : > { %p315_p10 = por %p314_p8, %p313_p5 }
  0x1a   : > { %p311_p7 = pneg %p310_p4 }
  0x1c   : > { %p316_p9 = pnand %p315_p10, %p311_p7 }
  0x1e   : > { %319 = shalt.err (!%p316_p9)
}
  0x1f   : > { %262 = dma.hbm_to_vmem [thread:$0]  (!%p478_p13), %s98_s26, 128, %s100_s28, %s88_s30  }
  0x20   : > { %p105_p2 = pnand %p247_p0, %p104_p1 }
  0x21   : > { %s499_s16 = sand.u32 (!%p105_p2), 1, %s393_s7  }
  0x22   : > { %108 = sbr.rel (%p105_p2) target bundleno = 74 (0x4a), region = 24  ;;  %s248_s20 = sshll.u32 (!%p105_p2), %s499_s16, 3 }
  0x23   : > { %s111_s21 = scalar_lea.sflag (!%p105_p2), [#allocation3], %s499_s16  ;;  %s114_s22 = scalar_lea.vmem (!%p105_p2), [#allocation2], %s248_s20 }
  0x27   : > { %380 = dma.done.wait (%p456_p6), %s111_s21, 128  }
  0x28   : > { %382 = vsyncadd (%p456_p6), %s111_s21, 4294967168  ;;  %v134_v0 = vld [vmem:[%s114_s22] sm:$0xff]  ;;  %s252_s23 = sshll.u32 %s434_s10, 3  ;;  %s133_s26 = scalar_lea.vmem [#allocation5], %s248_s20 }
  0x29   : > { %v250_v1 = vmul.f32 -1.442695, %v134_v0  ;;  %s167_s25 = scalar_lea.hbm %s541_s1, %s252_s23  ;;  %s169_s27 = sshll.u32 %s133_s26, 4  ;;  %s170_s27 = int_to_ptr.vmem [resolvable:$true] %s169_s27 }
  0x2a   : > { %s171_s28 = sshll.u32 %s167_s25, 4  ;;  %s157_s10 = scalar_lea.sflag [#allocation4], %s499_s16  ;;  %s172_s28 = int_to_ptr.hbm [resolvable:$true] %s171_s28 }
  0x2b   : > { %301 = vpow2.f32 %v250_v1  ;;  %s349_s29 = sshra.s32 %s172_s28, 4  ;;  %s355_s4 = scalar_lea.hbm %s541_s1, 16  ;;  %s350_s29 = int_to_ptr.hbm [resolvable:$true] %s349_s29 }
  0x2c   : > { %s351_s30 = scalar_lea.hbm %s350_s29, 8  ;;  %p356_p0 = scmp.lt.s32.totalorder %s350_s29, %s541_s1 }
  0x2d   : > { %p352_p6 = scmp.ne.s32.totalorder %s350_s29, %s351_s30  ;;  %p357_p1 = scmp.lt.s32.totalorder %s355_s4, %s351_s30 }
  0x2f   : > { %p353_p9 = pnand %p352_p6, %p463_p11  ;;  %p358_p3 = por %p357_p1, %p356_p0 }
  0x31   : > { %v302_v2 = vpop.eup %301  ;;  %p354_p13 = pneg %p353_p9 }
  0x32   : > { %v138_v3 = vadd.f32 1.0, %v302_v2 }
  0x33   : > { %p359_p4 = pnand %p358_p3, %p354_p13 }
  0x34   : > { %303 = vrcp.f32 %v138_v3  ;;  %v150_v6 = vand.u32 2147483648, %v138_v3  ;;  %vm144_vm0 = vweird.f32 %v138_v3  ;;  %v148_v8 = vand.u32 2147483647, %v138_v3 }
  0x36   : > { %v151_v10 = vor.u32 1.1754944e-38, %v150_v6  ;;  %vm149_vm3 = vcmp.eq.f32.partialorder %v148_v8, 8.507059e+37 }
  0x3a   : > { %v304_v4 = vpop.eup %303 }
  0x3b   : > { %v140_v5 = vmul.f32 %v304_v4, %v138_v3  ;;  %vm145_vm1 = vweird.f32 %v304_v4 }
  0x3c   : > { %vm146_vm2 = vmor %vm144_vm0, %vm145_vm1 }
  0x3d   : > { %v141_v7 = vsub.f32 1.0, %v140_v5 }
  0x3f   : > { %v142_v9 = vmul.f32 %v304_v4, %v141_v7 }
  0x41   : > { %v143_v11 = vadd.f32 %v304_v4, %v142_v9 }
  0x43   : > { %v147_v12 = vsel %vm146_vm2, %v304_v4, %v143_v11 }
  0x44   : > { %v152_v13 = vsel %vm149_vm3, %v151_v10, %v147_v12 }
  0x45   : > { %v154_v14 = vmul.f32 %v152_v13, %v134_v0 }
  0x47   : > { %155 = vst [vmem:[%s133_s26] sm:$0xff] %v154_v14 }
  0x48   : > { %362 = shalt.err (!%p359_p4)
}
  0x49   : > { %257 = dma.vmem_to_hbm [thread:$0]  (%p463_p11), %s170_s27, 128, %s172_s28, %s157_s10  }
  0x4a PF: > { %s183_s13 = sand.u32 1, %s389_s6   ;;  %p547_p7 = scmp.ge.s32.totalorder %s401_s9, 2 }
  0x4b   : > { %s184_s14 = scalar_lea.sflag [#allocation4], %s183_s13 }
  0x4c   : > { %p264_p5 = pnand %p547_p7, %p467_p12 }
  0x4e   : > { %p265_p8 = pneg %p264_p5 }
  0x50   : > { %384 = dma.done.wait (%p265_p8), %s184_s14, 128  }
  0x51   : > { %386 = vsyncadd (%p265_p8), %s184_s14, 4294967168  ;;  %p14_p10 = scmp.ge.s32.totalorder %s438_s12, 4   ;;  %s548_s6 = smov %s393_s7 }
  0x52   : > { %s549_s7 = smov %s397_s8  ;;  %s550_s8 = smov %s450_s15 }
  0x53   : > { %s551_s9 = smov %s438_s12  ;;  %16 = sbr.rel (!%p14_p10) target bundleno = 5 (0x5), region = 69 }
  0x58   :  { %190 = vsyncpa [#allocation3], 1 }
  0x59   :  { %192 = vsyncpa [#allocation3 + $0x1], 1 }
  0x5a   :  { %193 = vsyncpa [#allocation4], 1 }
  0x5b   :  { %195 = vsyncpa [#allocation4 + $0x1], 1 }

</bundles_post_ra>
